<compile_context>
chip_gen: v7x
topology: tpu7x:2x2x1
jax: 0.10.0
libtpu: 0.0.40
codegen_flags: <defaults>
</compile_context>

<pallas_src>
import functools
import math

import jax
import jax.numpy as jnp
from jax.experimental import pallas as pl
from jax.experimental.pallas import tpu as pltpu


# ---------------------------------------------------------------------------
# Fused kernel: Bt batch elements, all heads + output layer, per grid step.
# ---------------------------------------------------------------------------
def gat_fused_kernel(x_ref, adj_ref, w1_ref, b1_ref, w2_ref, b2_ref,
                     o_ref, xcat_ref, *, bt: int, n: int, nheads: int,
                     f_hid: int, f_out: int):
    H = nheads * f_hid
    neg_big = jnp.float32(-9000000000000000.0)

    def leaky(v):
        # nn.LeakyReLU(negative_slope=-0.2): x if x>=0 else -0.2*x
        return jnp.where(v >= 0.0, v, jnp.float32(-0.2) * v)

    def elu(v):
        return jnp.where(v > 0.0, v, jnp.exp(v) - 1.0)

    def masked_softmax(e, mask):
        att = jnp.where(mask, e, neg_big)
        m = jnp.max(att, axis=-1, keepdims=True)
        p = jnp.exp(att - m)
        denom = jnp.sum(p, axis=-1, keepdims=True)
        return p * pl.reciprocal(denom, approx=True)   # EUP slot, ~free

    # int8 adjacency -> f32 once; everything downstream is plain f32.
    adj_f = adj_ref[...].astype(jnp.float32)            # (bt, n, n)

    # ---- stage 1: all heads' projection + attention logits in ONE matmul ----
    # w1 = [W_all | W_all@a_src | W_all@a_dst]  (folded on host)
    h_ext = jnp.dot(x_ref[...], w1_ref[...],
                    preferred_element_type=jnp.float32)  # (bt*n, H+2*nheads) f32

    for b in range(bt):                                  # static, bt is small
        r0 = b * n
        mask = adj_f[b] > 0.0                            # (n, n)
        f_src = h_ext[r0:r0 + n, H:H + nheads]           # (n, nheads)
        f_dst_t = h_ext[r0:r0 + n, H + nheads:H + 2 * nheads].T   # (nheads, n)
        for k in range(nheads):
            e_k = leaky(f_src[:, k:k + 1] + f_dst_t[k:k + 1, :])  # (n, n)
            att_k = masked_softmax(e_k, mask)
            h_k = h_ext[r0:r0 + n, k * f_hid:(k + 1) * f_hid]     # (n, f_hid)
            # write head result straight into its lane slot of the scratch;
            # bounds live ranges of e_k/att_k/h_k to this iteration.
            xcat_ref[r0:r0 + n, k * f_hid:(k + 1) * f_hid] = jnp.dot(
                att_k.astype(jnp.bfloat16), h_k.astype(jnp.bfloat16),
                preferred_element_type=jnp.float32)

    # concatenated heads + per-head biases, inner ELU (elementwise, f32)
    xcat = elu(xcat_ref[...] + b1_ref[...])              # (bt*n, H)

    # ---- stage 2: output layer projection + logits in ONE matmul ----
    # w2 = [W_out | W_out@a_src | W_out@a_dst]  (folded on host)
    ho_ext = jnp.dot(xcat.astype(jnp.bfloat16), w2_ref[...],
                     preferred_element_type=jnp.float32)  # (bt*n, f_out+2)

    for b in range(bt):
        r0 = b * n
        mask = adj_f[b] > 0.0
        h_o = ho_ext[r0:r0 + n, :f_out]                   # (n, f_out)
        e_o = leaky(ho_ext[r0:r0 + n, f_out:f_out + 1]
                    + ho_ext[r0:r0 + n, f_out + 1:f_out + 2].T)    # (n, n)
        att_o = masked_softmax(e_o, mask)
        hp = jnp.dot(att_o.astype(jnp.bfloat16), h_o.astype(jnp.bfloat16),
                     preferred_element_type=jnp.float32) + b2_ref[...]
        # layer-internal F.elu, then GAT.forward's extra F.elu
        o_ref[r0:r0 + n, :] = elu(elu(hp)).astype(o_ref.dtype)


# ---------------------------------------------------------------------------
# Wrapper: fold attention vectors into weights, pack batch, launch one call.
# ---------------------------------------------------------------------------
def _pick_bt(batch: int, n: int, max_rows: int = 256) -> int:
    """Largest divisor of `batch` such that bt*n rows stay modest in VMEM."""
    bt = 1
    for cand in range(1, batch + 1):
        if batch % cand == 0 and cand * n <= max_rows:
            bt = cand
    return bt


def gat_forward(x, adj, head_params, out_params):
    B, N, Fin = x.shape
    nheads = len(head_params)
    f_hid = head_params[0][0].shape[1]
    f_out = out_params[0].shape[1]
    H = nheads * f_hid

    # --- fold attention vectors into projection weights (host-side prep) ---
    W_all = jnp.concatenate([W for (W, _, _) in head_params], axis=1)   # (Fin, H)
    Wa_src = jnp.concatenate([W @ a[:f_hid] for (W, a, _) in head_params],
                             axis=1)                                    # (Fin, nheads)
    Wa_dst = jnp.concatenate([W @ a[f_hid:] for (W, a, _) in head_params],
                             axis=1)                                    # (Fin, nheads)
    W1_ext = jnp.concatenate([W_all, Wa_src, Wa_dst],
                             axis=1).astype(jnp.bfloat16)               # (Fin, H+2*nh)
    b1 = jnp.concatenate([b for (_, _, b) in head_params], axis=1)      # (1, H) f32

    W_o, a_o, b_o = out_params
    W2_ext = jnp.concatenate([W_o, W_o @ a_o[:f_out], W_o @ a_o[f_out:]],
                             axis=1).astype(jnp.bfloat16)               # (H, f_out+2)

    # --- batch packing: fill MXU sublanes, amortize per-step grid overhead ---
    bt = _pick_bt(B, N)
    grid = (B // bt,)

    x_rows = x.reshape(B * N, Fin).astype(jnp.bfloat16)   # bf16 MXU operand
    adj_i8 = (adj > 0).astype(jnp.int8)                    # 4x smaller DMA

    kernel = functools.partial(gat_fused_kernel, bt=bt, n=N,
                               nheads=nheads, f_hid=f_hid, f_out=f_out)

    out_rows = pl.pallas_call(
        kernel,
        out_shape=jax.ShapeDtypeStruct((B * N, f_out), jnp.float32),
        grid=grid,
        in_specs=[
            pl.BlockSpec((bt * N, Fin), lambda i: (i, 0)),             # x rows
            pl.BlockSpec((bt, N, N), lambda i: (i, 0, 0)),             # adj (int8)
            pl.BlockSpec((Fin, H + 2 * nheads), lambda i: (0, 0)),     # W1_ext
            pl.BlockSpec((1, H), lambda i: (0, 0)),                    # b1
            pl.BlockSpec((H, f_out + 2), lambda i: (0, 0)),            # W2_ext
            pl.BlockSpec((1, f_out), lambda i: (0, 0)),                # b_out
        ],
        out_specs=pl.BlockSpec((bt * N, f_out), lambda i: (i, 0)),
        scratch_shapes=[pltpu.VMEM((bt * N, H), jnp.float32)],         # xcat scratch
        compiler_params=pltpu.CompilerParams(
            dimension_semantics=("parallel",)),   # batch blocks shard across v7x TCs
    )(x_rows, adj_i8, W1_ext, b1, W2_ext, b_o)

    return out_rows.reshape(B, N, f_out)


# ---------------------------------------------------------------------------
# Deterministic parameter initialization (xavier_uniform, gain=1.414).
# ---------------------------------------------------------------------------
def xavier_uniform(key, shape, gain=1.414):
    fan_in, fan_out = shape[1], shape[0]   # torch convention for 2-D tensors
    bound = gain * math.sqrt(6.0 / (fan_in + fan_out))
    return jax.random.uniform(key, shape, jnp.float32, -bound, bound)


def init_gat_layer(key, in_f, out_f):
    kW, ka, kb = jax.random.split(key, 3)
    W = xavier_uniform(kW, (in_f, out_f))
    a = xavier_uniform(ka, (2 * out_f, 1))
    b = xavier_uniform(kb, (1, out_f))
    return W, a, b


if __name__ == "__main__":
    # Small shapes consistent with the module's forward:
    # x: (batch, num_nodes, in_feats), adj: (batch, num_nodes, num_nodes)
    B, N = 2, 8
    in_feats, hid_feats, out_feats, nheads = 16, 32, 32, 2

    key = jax.random.PRNGKey(0)
    kx, kadj, kp = jax.random.split(key, 3)

    x = jax.random.normal(kx, (B, N, in_feats), dtype=jnp.float32)
    # random binary adjacency with self-loops
    adj = (jax.random.uniform(kadj, (B, N, N)) > 0.4).astype(jnp.float32)
    adj = jnp.maximum(adj, jnp.eye(N, dtype=jnp.float32)[None])

    # parameters: nheads attention heads + one output layer
    head_keys = jax.random.split(kp, nheads + 1)
    head_params = [init_gat_layer(head_keys[i], in_feats, hid_feats)
                   for i in range(nheads)]
    out_params = init_gat_layer(head_keys[nheads], hid_feats * nheads,
                                out_feats)

    # TODO(synk): dropout layers are identity (eval mode); no RNG dropout in-kernel.
    out = gat_forward(x, adj, head_params, out_params)
    jax.block_until_ready(out)
    assert out.shape == (B, N, out_feats)
    print("KERNEL_OK")
</pallas_src>

<mosaic_0001>
module attributes {stable_mosaic.version = 11 : i64} {
  func.func @gat_fused_kernel(%arg0: i32, %arg1: memref<16x16xbf16, #tpu.memory_space<vmem>>, %arg2: memref<2x8x8xi8, #tpu.memory_space<vmem>>, %arg3: memref<16x68xbf16, #tpu.memory_space<vmem>>, %arg4: memref<1x64xf32, #tpu.memory_space<vmem>>, %arg5: memref<64x34xbf16, #tpu.memory_space<vmem>>, %arg6: memref<1x32xf32, #tpu.memory_space<vmem>>, %arg7: memref<16x32xf32, #tpu.memory_space<vmem>>, %arg8: memref<16x64xf32, #tpu.memory_space<vmem>>) attributes {dimension_semantics = [#tpu.dimension_semantics<parallel>], iteration_bounds = array<i64: 1>, scalar_prefetch = 0 : i64, scratch_operands = 1 : i64, tpu.core_type = #tpu.core_type<tc>, window_params = [{transform_indices = @transform_0, window_bounds = array<i64: 16, 16>}, {transform_indices = @transform_1, window_bounds = array<i64: 2, 8, 8>}, {pipeline_mode = #tpu.pipeline_mode<synchronous>, transform_indices = @transform_2, window_bounds = array<i64: 16, 68>}, {pipeline_mode = #tpu.pipeline_mode<synchronous>, transform_indices = @transform_3, window_bounds = array<i64: 1, 64>}, {pipeline_mode = #tpu.pipeline_mode<synchronous>, transform_indices = @transform_4, window_bounds = array<i64: 64, 34>}, {pipeline_mode = #tpu.pipeline_mode<synchronous>, transform_indices = @transform_5, window_bounds = array<i64: 1, 32>}, {transform_indices = @transform_6, window_bounds = array<i64: 16, 32>}]} {
    %c0 = arith.constant 0 : index
    %c0_0 = arith.constant 0 : index
    %c0_1 = arith.constant 0 : index
    %0 = vector.load %arg2[%c0, %c0_0, %c0_1] : memref<2x8x8xi8, #tpu.memory_space<vmem>>, vector<2x8x8xi8>
    %1 = arith.sitofp %0 : vector<2x8x8xi8> to vector<2x8x8xf32>
    %c0_2 = arith.constant 0 : index
    %c0_3 = arith.constant 0 : index
    %2 = vector.load %arg1[%c0_2, %c0_3] : memref<16x16xbf16, #tpu.memory_space<vmem>>, vector<16x16xbf16>
    %c0_4 = arith.constant 0 : index
    %c0_5 = arith.constant 0 : index
    %3 = vector.load %arg3[%c0_4, %c0_5] : memref<16x68xbf16, #tpu.memory_space<vmem>>, vector<16x68xbf16>
    %cst = arith.constant dense<0.000000e+00> : vector<16x68xf32>
    %4 = tpu.matmul %2, %3, %cst {dimension_numbers = #tpu.dot_dimension_numbers<[1], [0], [0], [1], [0, 0, 1, 1], [], []>} : vector<16x16xbf16>, vector<16x68xbf16>, vector<16x68xf32> -> vector<16x68xf32>
    %5 = vector.extract_strided_slice %1 {offsets = [0, 0, 0], sizes = [1, 8, 8], strides = [1, 1, 1]} : vector<2x8x8xf32> to vector<1x8x8xf32>
    %6 = vector.shape_cast %5 : vector<1x8x8xf32> to vector<8x8xf32>
    %cst_6 = arith.constant 0.000000e+00 : f32
    %7 = vector.broadcast %cst_6 : f32 to vector<8x8xf32>
    %8 = arith.cmpf ogt, %6, %7 : vector<8x8xf32>
    %9 = vector.extract_strided_slice %4 {offsets = [0, 64], sizes = [8, 2], strides = [1, 1]} : vector<16x68xf32> to vector<8x2xf32>
    %10 = vector.extract_strided_slice %4 {offsets = [0, 66], sizes = [8, 2], strides = [1, 1]} : vector<16x68xf32> to vector<8x2xf32>
    %11 = tpu.transpose %10, [1, 0] : vector<8x2xf32> -> vector<2x8xf32>
    %12 = vector.extract_strided_slice %9 {offsets = [0, 0], sizes = [8, 1], strides = [1, 1]} : vector<8x2xf32> to vector<8x1xf32>
    %13 = vector.extract_strided_slice %11 {offsets = [0, 0], sizes = [1, 8], strides = [1, 1]} : vector<2x8xf32> to vector<1x8xf32>
    %14 = vector.broadcast %12 : vector<8x1xf32> to vector<8x8xf32>
    %15 = vector.broadcast %13 : vector<1x8xf32> to vector<8x8xf32>
    %16 = arith.addf %14, %15 : vector<8x8xf32>
    %cst_7 = arith.constant 0.000000e+00 : f32
    %17 = vector.broadcast %cst_7 : f32 to vector<8x8xf32>
    %18 = arith.cmpf oge, %16, %17 : vector<8x8xf32>
    %cst_8 = arith.constant -2.000000e-01 : f32
    %19 = vector.broadcast %cst_8 : f32 to vector<8x8xf32>
    %20 = arith.mulf %19, %16 : vector<8x8xf32>
    %21 = arith.select %18, %16, %20 : vector<8x8xi1>, vector<8x8xf32>
    %cst_9 = arith.constant -9.000000e+15 : f32
    %22 = vector.broadcast %cst_9 : f32 to vector<8x8xf32>
    %23 = arith.select %8, %21, %22 : vector<8x8xi1>, vector<8x8xf32>
    %cst_10 = arith.constant dense<0xFF800000> : vector<8xf32>
    %24 = vector.multi_reduction <maximumf>, %23, %cst_10 [1] : vector<8x8xf32> to vector<8xf32>
    %25 = vector.shape_cast %24 : vector<8xf32> to vector<8x1xf32>
    %26 = vector.broadcast %25 : vector<8x1xf32> to vector<8x8xf32>
    %27 = arith.subf %23, %26 : vector<8x8xf32>
    %28 = math.exp %27 : vector<8x8xf32>
    %cst_11 = arith.constant dense<0.000000e+00> : vector<8xf32>
    %29 = vector.multi_reduction <add>, %28, %cst_11 [1] : vector<8x8xf32> to vector<8xf32>
    %30 = vector.shape_cast %29 : vector<8xf32> to vector<8x1xf32>
    %31 = tpu.reciprocal %30 {approx = true} : vector<8x1xf32> -> vector<8x1xf32>
    %32 = vector.broadcast %31 : vector<8x1xf32> to vector<8x8xf32>
    %33 = arith.mulf %28, %32 : vector<8x8xf32>
    %34 = vector.extract_strided_slice %4 {offsets = [0, 0], sizes = [8, 32], strides = [1, 1]} : vector<16x68xf32> to vector<8x32xf32>
    %35 = arith.truncf %33 : vector<8x8xf32> to vector<8x8xbf16>
    %36 = arith.truncf %34 : vector<8x32xf32> to vector<8x32xbf16>
    %cst_12 = arith.constant dense<0.000000e+00> : vector<8x32xf32>
    %37 = tpu.matmul %35, %36, %cst_12 {dimension_numbers = #tpu.dot_dimension_numbers<[1], [0], [0], [1], [0, 0, 1, 1], [], []>} : vector<8x8xbf16>, vector<8x32xbf16>, vector<8x32xf32> -> vector<8x32xf32>
    %c0_13 = arith.constant 0 : index
    %c0_14 = arith.constant 0 : index
    %38 = vector.load %arg8[%c0_13, %c0_14] : memref<16x64xf32, #tpu.memory_space<vmem>>, vector<8x32xf32>
    tpu.vector_store %arg8[%c0_13, %c0_14], %37 {strides = array<i32>} : memref<16x64xf32, #tpu.memory_space<vmem>>, vector<8x32xf32>,
    %39 = vector.extract_strided_slice %9 {offsets = [0, 1], sizes = [8, 1], strides = [1, 1]} : vector<8x2xf32> to vector<8x1xf32>
    %40 = vector.extract_strided_slice %11 {offsets = [1, 0], sizes = [1, 8], strides = [1, 1]} : vector<2x8xf32> to vector<1x8xf32>
    %41 = vector.broadcast %39 : vector<8x1xf32> to vector<8x8xf32>
    %42 = vector.broadcast %40 : vector<1x8xf32> to vector<8x8xf32>
    %43 = arith.addf %41, %42 : vector<8x8xf32>
    %cst_15 = arith.constant 0.000000e+00 : f32
    %44 = vector.broadcast %cst_15 : f32 to vector<8x8xf32>
    %45 = arith.cmpf oge, %43, %44 : vector<8x8xf32>
    %cst_16 = arith.constant -2.000000e-01 : f32
    %46 = vector.broadcast %cst_16 : f32 to vector<8x8xf32>
    %47 = arith.mulf %46, %43 : vector<8x8xf32>
    %48 = arith.select %45, %43, %47 : vector<8x8xi1>, vector<8x8xf32>
    %cst_17 = arith.constant -9.000000e+15 : f32
    %49 = vector.broadcast %cst_17 : f32 to vector<8x8xf32>
    %50 = arith.select %8, %48, %49 : vector<8x8xi1>, vector<8x8xf32>
    %cst_18 = arith.constant dense<0xFF800000> : vector<8xf32>
    %51 = vector.multi_reduction <maximumf>, %50, %cst_18 [1] : vector<8x8xf32> to vector<8xf32>
    %52 = vector.shape_cast %51 : vector<8xf32> to vector<8x1xf32>
    %53 = vector.broadcast %52 : vector<8x1xf32> to vector<8x8xf32>
    %54 = arith.subf %50, %53 : vector<8x8xf32>
    %55 = math.exp %54 : vector<8x8xf32>
    %cst_19 = arith.constant dense<0.000000e+00> : vector<8xf32>
    %56 = vector.multi_reduction <add>, %55, %cst_19 [1] : vector<8x8xf32> to vector<8xf32>
    %57 = vector.shape_cast %56 : vector<8xf32> to vector<8x1xf32>
    %58 = tpu.reciprocal %57 {approx = true} : vector<8x1xf32> -> vector<8x1xf32>
    %59 = vector.broadcast %58 : vector<8x1xf32> to vector<8x8xf32>
    %60 = arith.mulf %55, %59 : vector<8x8xf32>
    %61 = vector.extract_strided_slice %4 {offsets = [0, 32], sizes = [8, 32], strides = [1, 1]} : vector<16x68xf32> to vector<8x32xf32>
    %62 = arith.truncf %60 : vector<8x8xf32> to vector<8x8xbf16>
    %63 = arith.truncf %61 : vector<8x32xf32> to vector<8x32xbf16>
    %cst_20 = arith.constant dense<0.000000e+00> : vector<8x32xf32>
    %64 = tpu.matmul %62, %63, %cst_20 {dimension_numbers = #tpu.dot_dimension_numbers<[1], [0], [0], [1], [0, 0, 1, 1], [], []>} : vector<8x8xbf16>, vector<8x32xbf16>, vector<8x32xf32> -> vector<8x32xf32>
    %c0_21 = arith.constant 0 : index
    %c32 = arith.constant 32 : index
    %65 = vector.load %arg8[%c0_21, %c32] : memref<16x64xf32, #tpu.memory_space<vmem>>, vector<8x32xf32>
    tpu.vector_store %arg8[%c0_21, %c32], %64 {strides = array<i32>} : memref<16x64xf32, #tpu.memory_space<vmem>>, vector<8x32xf32>,
    %66 = vector.extract_strided_slice %1 {offsets = [1, 0, 0], sizes = [1, 8, 8], strides = [1, 1, 1]} : vector<2x8x8xf32> to vector<1x8x8xf32>
    %67 = vector.shape_cast %66 : vector<1x8x8xf32> to vector<8x8xf32>
    %cst_22 = arith.constant 0.000000e+00 : f32
    %68 = vector.broadcast %cst_22 : f32 to vector<8x8xf32>
    %69 = arith.cmpf ogt, %67, %68 : vector<8x8xf32>
    %70 = vector.extract_strided_slice %4 {offsets = [8, 64], sizes = [8, 2], strides = [1, 1]} : vector<16x68xf32> to vector<8x2xf32>
    %71 = vector.extract_strided_slice %4 {offsets = [8, 66], sizes = [8, 2], strides = [1, 1]} : vector<16x68xf32> to vector<8x2xf32>
    %72 = tpu.transpose %71, [1, 0] : vector<8x2xf32> -> vector<2x8xf32>
    %73 = vector.extract_strided_slice %70 {offsets = [0, 0], sizes = [8, 1], strides = [1, 1]} : vector<8x2xf32> to vector<8x1xf32>
    %74 = vector.extract_strided_slice %72 {offsets = [0, 0], sizes = [1, 8], strides = [1, 1]} : vector<2x8xf32> to vector<1x8xf32>
    %75 = vector.broadcast %73 : vector<8x1xf32> to vector<8x8xf32>
    %76 = vector.broadcast %74 : vector<1x8xf32> to vector<8x8xf32>
    %77 = arith.addf %75, %76 : vector<8x8xf32>
    %cst_23 = arith.constant 0.000000e+00 : f32
    %78 = vector.broadcast %cst_23 : f32 to vector<8x8xf32>
    %79 = arith.cmpf oge, %77, %78 : vector<8x8xf32>
    %cst_24 = arith.constant -2.000000e-01 : f32
    %80 = vector.broadcast %cst_24 : f32 to vector<8x8xf32>
    %81 = arith.mulf %80, %77 : vector<8x8xf32>
    %82 = arith.select %79, %77, %81 : vector<8x8xi1>, vector<8x8xf32>
    %cst_25 = arith.constant -9.000000e+15 : f32
    %83 = vector.broadcast %cst_25 : f32 to vector<8x8xf32>
    %84 = arith.select %69, %82, %83 : vector<8x8xi1>, vector<8x8xf32>
    %cst_26 = arith.constant dense<0xFF800000> : vector<8xf32>
    %85 = vector.multi_reduction <maximumf>, %84, %cst_26 [1] : vector<8x8xf32> to vector<8xf32>
    %86 = vector.shape_cast %85 : vector<8xf32> to vector<8x1xf32>
    %87 = vector.broadcast %86 : vector<8x1xf32> to vector<8x8xf32>
    %88 = arith.subf %84, %87 : vector<8x8xf32>
    %89 = math.exp %88 : vector<8x8xf32>
    %cst_27 = arith.constant dense<0.000000e+00> : vector<8xf32>
    %90 = vector.multi_reduction <add>, %89, %cst_27 [1] : vector<8x8xf32> to vector<8xf32>
    %91 = vector.shape_cast %90 : vector<8xf32> to vector<8x1xf32>
    %92 = tpu.reciprocal %91 {approx = true} : vector<8x1xf32> -> vector<8x1xf32>
    %93 = vector.broadcast %92 : vector<8x1xf32> to vector<8x8xf32>
    %94 = arith.mulf %89, %93 : vector<8x8xf32>
    %95 = vector.extract_strided_slice %4 {offsets = [8, 0], sizes = [8, 32], strides = [1, 1]} : vector<16x68xf32> to vector<8x32xf32>
    %96 = arith.truncf %94 : vector<8x8xf32> to vector<8x8xbf16>
    %97 = arith.truncf %95 : vector<8x32xf32> to vector<8x32xbf16>
    %cst_28 = arith.constant dense<0.000000e+00> : vector<8x32xf32>
    %98 = tpu.matmul %96, %97, %cst_28 {dimension_numbers = #tpu.dot_dimension_numbers<[1], [0], [0], [1], [0, 0, 1, 1], [], []>} : vector<8x8xbf16>, vector<8x32xbf16>, vector<8x32xf32> -> vector<8x32xf32>
    %c8 = arith.constant 8 : index
    %c0_29 = arith.constant 0 : index
    %99 = vector.load %arg8[%c8, %c0_29] : memref<16x64xf32, #tpu.memory_space<vmem>>, vector<8x32xf32>
    tpu.vector_store %arg8[%c8, %c0_29], %98 {strides = array<i32>} : memref<16x64xf32, #tpu.memory_space<vmem>>, vector<8x32xf32>,
    %100 = vector.extract_strided_slice %70 {offsets = [0, 1], sizes = [8, 1], strides = [1, 1]} : vector<8x2xf32> to vector<8x1xf32>
    %101 = vector.extract_strided_slice %72 {offsets = [1, 0], sizes = [1, 8], strides = [1, 1]} : vector<2x8xf32> to vector<1x8xf32>
    %102 = vector.broadcast %100 : vector<8x1xf32> to vector<8x8xf32>
    %103 = vector.broadcast %101 : vector<1x8xf32> to vector<8x8xf32>
    %104 = arith.addf %102, %103 : vector<8x8xf32>
    %cst_30 = arith.constant 0.000000e+00 : f32
    %105 = vector.broadcast %cst_30 : f32 to vector<8x8xf32>
    %106 = arith.cmpf oge, %104, %105 : vector<8x8xf32>
    %cst_31 = arith.constant -2.000000e-01 : f32
    %107 = vector.broadcast %cst_31 : f32 to vector<8x8xf32>
    %108 = arith.mulf %107, %104 : vector<8x8xf32>
    %109 = arith.select %106, %104, %108 : vector<8x8xi1>, vector<8x8xf32>
    %cst_32 = arith.constant -9.000000e+15 : f32
    %110 = vector.broadcast %cst_32 : f32 to vector<8x8xf32>
    %111 = arith.select %69, %109, %110 : vector<8x8xi1>, vector<8x8xf32>
    %cst_33 = arith.constant dense<0xFF800000> : vector<8xf32>
    %112 = vector.multi_reduction <maximumf>, %111, %cst_33 [1] : vector<8x8xf32> to vector<8xf32>
    %113 = vector.shape_cast %112 : vector<8xf32> to vector<8x1xf32>
    %114 = vector.broadcast %113 : vector<8x1xf32> to vector<8x8xf32>
    %115 = arith.subf %111, %114 : vector<8x8xf32>
    %116 = math.exp %115 : vector<8x8xf32>
    %cst_34 = arith.constant dense<0.000000e+00> : vector<8xf32>
    %117 = vector.multi_reduction <add>, %116, %cst_34 [1] : vector<8x8xf32> to vector<8xf32>
    %118 = vector.shape_cast %117 : vector<8xf32> to vector<8x1xf32>
    %119 = tpu.reciprocal %118 {approx = true} : vector<8x1xf32> -> vector<8x1xf32>
    %120 = vector.broadcast %119 : vector<8x1xf32> to vector<8x8xf32>
    %121 = arith.mulf %116, %120 : vector<8x8xf32>
    %122 = vector.extract_strided_slice %4 {offsets = [8, 32], sizes = [8, 32], strides = [1, 1]} : vector<16x68xf32> to vector<8x32xf32>
    %123 = arith.truncf %121 : vector<8x8xf32> to vector<8x8xbf16>
    %124 = arith.truncf %122 : vector<8x32xf32> to vector<8x32xbf16>
    %cst_35 = arith.constant dense<0.000000e+00> : vector<8x32xf32>
    %125 = tpu.matmul %123, %124, %cst_35 {dimension_numbers = #tpu.dot_dimension_numbers<[1], [0], [0], [1], [0, 0, 1, 1], [], []>} : vector<8x8xbf16>, vector<8x32xbf16>, vector<8x32xf32> -> vector<8x32xf32>
    %c8_36 = arith.constant 8 : index
    %c32_37 = arith.constant 32 : index
    %126 = vector.load %arg8[%c8_36, %c32_37] : memref<16x64xf32, #tpu.memory_space<vmem>>, vector<8x32xf32>
    tpu.vector_store %arg8[%c8_36, %c32_37], %125 {strides = array<i32>} : memref<16x64xf32, #tpu.memory_space<vmem>>, vector<8x32xf32>,
    %c0_38 = arith.constant 0 : index
    %c0_39 = arith.constant 0 : index
    %127 = vector.load %arg8[%c0_38, %c0_39] : memref<16x64xf32, #tpu.memory_space<vmem>>, vector<16x64xf32>
    %c0_40 = arith.constant 0 : index
    %c0_41 = arith.constant 0 : index
    %128 = vector.load %arg4[%c0_40, %c0_41] : memref<1x64xf32, #tpu.memory_space<vmem>>, vector<1x64xf32>
    %129 = vector.broadcast %128 : vector<1x64xf32> to vector<16x64xf32>
    %130 = arith.addf %127, %129 : vector<16x64xf32>
    %cst_42 = arith.constant 0.000000e+00 : f32
    %131 = vector.broadcast %cst_42 : f32 to vector<16x64xf32>
    %132 = arith.cmpf ogt, %130, %131 : vector<16x64xf32>
    %133 = math.exp %130 : vector<16x64xf32>
    %cst_43 = arith.constant 1.000000e+00 : f32
    %134 = vector.broadcast %cst_43 : f32 to vector<16x64xf32>
    %135 = arith.subf %133, %134 : vector<16x64xf32>
    %136 = arith.select %132, %130, %135 : vector<16x64xi1>, vector<16x64xf32>
    %137 = arith.truncf %136 : vector<16x64xf32> to vector<16x64xbf16>
    %c0_44 = arith.constant 0 : index
    %c0_45 = arith.constant 0 : index
    %138 = vector.load %arg5[%c0_44, %c0_45] : memref<64x34xbf16, #tpu.memory_space<vmem>>, vector<64x34xbf16>
    %cst_46 = arith.constant dense<0.000000e+00> : vector<16x34xf32>
    %139 = tpu.matmul %137, %138, %cst_46 {dimension_numbers = #tpu.dot_dimension_numbers<[1], [0], [0], [1], [0, 0, 1, 1], [], []>} : vector<16x64xbf16>, vector<64x34xbf16>, vector<16x34xf32> -> vector<16x34xf32>
    %140 = vector.extract_strided_slice %1 {offsets = [0, 0, 0], sizes = [1, 8, 8], strides = [1, 1, 1]} : vector<2x8x8xf32> to vector<1x8x8xf32>
    %141 = vector.shape_cast %140 : vector<1x8x8xf32> to vector<8x8xf32>
    %cst_47 = arith.constant 0.000000e+00 : f32
    %142 = vector.broadcast %cst_47 : f32 to vector<8x8xf32>
    %143 = arith.cmpf ogt, %141, %142 : vector<8x8xf32>
    %144 = vector.extract_strided_slice %139 {offsets = [0, 0], sizes = [8, 32], strides = [1, 1]} : vector<16x34xf32> to vector<8x32xf32>
    %145 = vector.extract_strided_slice %139 {offsets = [0, 32], sizes = [8, 1], strides = [1, 1]} : vector<16x34xf32> to vector<8x1xf32>
    %146 = vector.extract_strided_slice %139 {offsets = [0, 33], sizes = [8, 1], strides = [1, 1]} : vector<16x34xf32> to vector<8x1xf32>
    %147 = tpu.transpose %146, [1, 0] : vector<8x1xf32> -> vector<1x8xf32>
    %148 = vector.broadcast %145 : vector<8x1xf32> to vector<8x8xf32>
    %149 = vector.broadcast %147 : vector<1x8xf32> to vector<8x8xf32>
    %150 = arith.addf %148, %149 : vector<8x8xf32>
    %cst_48 = arith.constant 0.000000e+00 : f32
    %151 = vector.broadcast %cst_48 : f32 to vector<8x8xf32>
    %152 = arith.cmpf oge, %150, %151 : vector<8x8xf32>
    %cst_49 = arith.constant -2.000000e-01 : f32
    %153 = vector.broadcast %cst_49 : f32 to vector<8x8xf32>
    %154 = arith.mulf %153, %150 : vector<8x8xf32>
    %155 = arith.select %152, %150, %154 : vector<8x8xi1>, vector<8x8xf32>
    %cst_50 = arith.constant -9.000000e+15 : f32
    %156 = vector.broadcast %cst_50 : f32 to vector<8x8xf32>
    %157 = arith.select %143, %155, %156 : vector<8x8xi1>, vector<8x8xf32>
    %cst_51 = arith.constant dense<0xFF800000> : vector<8xf32>
    %158 = vector.multi_reduction <maximumf>, %157, %cst_51 [1] : vector<8x8xf32> to vector<8xf32>
    %159 = vector.shape_cast %158 : vector<8xf32> to vector<8x1xf32>
    %160 = vector.broadcast %159 : vector<8x1xf32> to vector<8x8xf32>
    %161 = arith.subf %157, %160 : vector<8x8xf32>
    %162 = math.exp %161 : vector<8x8xf32>
    %cst_52 = arith.constant dense<0.000000e+00> : vector<8xf32>
    %163 = vector.multi_reduction <add>, %162, %cst_52 [1] : vector<8x8xf32> to vector<8xf32>
    %164 = vector.shape_cast %163 : vector<8xf32> to vector<8x1xf32>
    %165 = tpu.reciprocal %164 {approx = true} : vector<8x1xf32> -> vector<8x1xf32>
    %166 = vector.broadcast %165 : vector<8x1xf32> to vector<8x8xf32>
    %167 = arith.mulf %162, %166 : vector<8x8xf32>
    %168 = arith.truncf %167 : vector<8x8xf32> to vector<8x8xbf16>
    %169 = arith.truncf %144 : vector<8x32xf32> to vector<8x32xbf16>
    %cst_53 = arith.constant dense<0.000000e+00> : vector<8x32xf32>
    %170 = tpu.matmul %168, %169, %cst_53 {dimension_numbers = #tpu.dot_dimension_numbers<[1], [0], [0], [1], [0, 0, 1, 1], [], []>} : vector<8x8xbf16>, vector<8x32xbf16>, vector<8x32xf32> -> vector<8x32xf32>
    %c0_54 = arith.constant 0 : index
    %c0_55 = arith.constant 0 : index
    %171 = vector.load %arg6[%c0_54, %c0_55] : memref<1x32xf32, #tpu.memory_space<vmem>>, vector<1x32xf32>
    %172 = vector.broadcast %171 : vector<1x32xf32> to vector<8x32xf32>
    %173 = arith.addf %170, %172 : vector<8x32xf32>
    %cst_56 = arith.constant 0.000000e+00 : f32
    %174 = vector.broadcast %cst_56 : f32 to vector<8x32xf32>
    %175 = arith.cmpf ogt, %173, %174 : vector<8x32xf32>
    %176 = math.exp %173 : vector<8x32xf32>
    %cst_57 = arith.constant 1.000000e+00 : f32
    %177 = vector.broadcast %cst_57 : f32 to vector<8x32xf32>
    %178 = arith.subf %176, %177 : vector<8x32xf32>
    %179 = arith.select %175, %173, %178 : vector<8x32xi1>, vector<8x32xf32>
    %cst_58 = arith.constant 0.000000e+00 : f32
    %180 = vector.broadcast %cst_58 : f32 to vector<8x32xf32>
    %181 = arith.cmpf ogt, %179, %180 : vector<8x32xf32>
    %182 = math.exp %179 : vector<8x32xf32>
    %cst_59 = arith.constant 1.000000e+00 : f32
    %183 = vector.broadcast %cst_59 : f32 to vector<8x32xf32>
    %184 = arith.subf %182, %183 : vector<8x32xf32>
    %185 = arith.select %181, %179, %184 : vector<8x32xi1>, vector<8x32xf32>
    %c0_60 = arith.constant 0 : index
    %c0_61 = arith.constant 0 : index
    %186 = vector.load %arg7[%c0_60, %c0_61] : memref<16x32xf32, #tpu.memory_space<vmem>>, vector<8x32xf32>
    tpu.vector_store %arg7[%c0_60, %c0_61], %185 {strides = array<i32>} : memref<16x32xf32, #tpu.memory_space<vmem>>, vector<8x32xf32>,
    %187 = vector.extract_strided_slice %1 {offsets = [1, 0, 0], sizes = [1, 8, 8], strides = [1, 1, 1]} : vector<2x8x8xf32> to vector<1x8x8xf32>
    %188 = vector.shape_cast %187 : vector<1x8x8xf32> to vector<8x8xf32>
    %cst_62 = arith.constant 0.000000e+00 : f32
    %189 = vector.broadcast %cst_62 : f32 to vector<8x8xf32>
    %190 = arith.cmpf ogt, %188, %189 : vector<8x8xf32>
    %191 = vector.extract_strided_slice %139 {offsets = [8, 0], sizes = [8, 32], strides = [1, 1]} : vector<16x34xf32> to vector<8x32xf32>
    %192 = vector.extract_strided_slice %139 {offsets = [8, 32], sizes = [8, 1], strides = [1, 1]} : vector<16x34xf32> to vector<8x1xf32>
    %193 = vector.extract_strided_slice %139 {offsets = [8, 33], sizes = [8, 1], strides = [1, 1]} : vector<16x34xf32> to vector<8x1xf32>
    %194 = tpu.transpose %193, [1, 0] : vector<8x1xf32> -> vector<1x8xf32>
    %195 = vector.broadcast %192 : vector<8x1xf32> to vector<8x8xf32>
    %196 = vector.broadcast %194 : vector<1x8xf32> to vector<8x8xf32>
    %197 = arith.addf %195, %196 : vector<8x8xf32>
    %cst_63 = arith.constant 0.000000e+00 : f32
    %198 = vector.broadcast %cst_63 : f32 to vector<8x8xf32>
    %199 = arith.cmpf oge, %197, %198 : vector<8x8xf32>
    %cst_64 = arith.constant -2.000000e-01 : f32
    %200 = vector.broadcast %cst_64 : f32 to vector<8x8xf32>
    %201 = arith.mulf %200, %197 : vector<8x8xf32>
    %202 = arith.select %199, %197, %201 : vector<8x8xi1>, vector<8x8xf32>
    %cst_65 = arith.constant -9.000000e+15 : f32
    %203 = vector.broadcast %cst_65 : f32 to vector<8x8xf32>
    %204 = arith.select %190, %202, %203 : vector<8x8xi1>, vector<8x8xf32>
    %cst_66 = arith.constant dense<0xFF800000> : vector<8xf32>
    %205 = vector.multi_reduction <maximumf>, %204, %cst_66 [1] : vector<8x8xf32> to vector<8xf32>
    %206 = vector.shape_cast %205 : vector<8xf32> to vector<8x1xf32>
    %207 = vector.broadcast %206 : vector<8x1xf32> to vector<8x8xf32>
    %208 = arith.subf %204, %207 : vector<8x8xf32>
    %209 = math.exp %208 : vector<8x8xf32>
    %cst_67 = arith.constant dense<0.000000e+00> : vector<8xf32>
    %210 = vector.multi_reduction <add>, %209, %cst_67 [1] : vector<8x8xf32> to vector<8xf32>
    %211 = vector.shape_cast %210 : vector<8xf32> to vector<8x1xf32>
    %212 = tpu.reciprocal %211 {approx = true} : vector<8x1xf32> -> vector<8x1xf32>
    %213 = vector.broadcast %212 : vector<8x1xf32> to vector<8x8xf32>
    %214 = arith.mulf %209, %213 : vector<8x8xf32>
    %215 = arith.truncf %214 : vector<8x8xf32> to vector<8x8xbf16>
    %216 = arith.truncf %191 : vector<8x32xf32> to vector<8x32xbf16>
    %cst_68 = arith.constant dense<0.000000e+00> : vector<8x32xf32>
    %217 = tpu.matmul %215, %216, %cst_68 {dimension_numbers = #tpu.dot_dimension_numbers<[1], [0], [0], [1], [0, 0, 1, 1], [], []>} : vector<8x8xbf16>, vector<8x32xbf16>, vector<8x32xf32> -> vector<8x32xf32>
    %c0_69 = arith.constant 0 : index
    %c0_70 = arith.constant 0 : index
    %218 = vector.load %arg6[%c0_69, %c0_70] : memref<1x32xf32, #tpu.memory_space<vmem>>, vector<1x32xf32>
    %219 = vector.broadcast %218 : vector<1x32xf32> to vector<8x32xf32>
    %220 = arith.addf %217, %219 : vector<8x32xf32>
    %cst_71 = arith.constant 0.000000e+00 : f32
    %221 = vector.broadcast %cst_71 : f32 to vector<8x32xf32>
    %222 = arith.cmpf ogt, %220, %221 : vector<8x32xf32>
    %223 = math.exp %220 : vector<8x32xf32>
    %cst_72 = arith.constant 1.000000e+00 : f32
    %224 = vector.broadcast %cst_72 : f32 to vector<8x32xf32>
    %225 = arith.subf %223, %224 : vector<8x32xf32>
    %226 = arith.select %222, %220, %225 : vector<8x32xi1>, vector<8x32xf32>
    %cst_73 = arith.constant 0.000000e+00 : f32
    %227 = vector.broadcast %cst_73 : f32 to vector<8x32xf32>
    %228 = arith.cmpf ogt, %226, %227 : vector<8x32xf32>
    %229 = math.exp %226 : vector<8x32xf32>
    %cst_74 = arith.constant 1.000000e+00 : f32
    %230 = vector.broadcast %cst_74 : f32 to vector<8x32xf32>
    %231 = arith.subf %229, %230 : vector<8x32xf32>
    %232 = arith.select %228, %226, %231 : vector<8x32xi1>, vector<8x32xf32>
    %c8_75 = arith.constant 8 : index
    %c0_76 = arith.constant 0 : index
    %233 = vector.load %arg7[%c8_75, %c0_76] : memref<16x32xf32, #tpu.memory_space<vmem>>, vector<8x32xf32>
    tpu.vector_store %arg7[%c8_75, %c0_76], %232 {strides = array<i32>} : memref<16x32xf32, #tpu.memory_space<vmem>>, vector<8x32xf32>,
    return
  }
  func.func @transform_0(%arg0: i32) -> (i32, i32) {
    %c0_i32 = arith.constant 0 : i32
    %c0_i32_0 = arith.constant 0 : i32
    return %arg0, %c0_i32 : i32, i32
  }
  func.func @transform_1(%arg0: i32) -> (i32, i32, i32) {
    %c0_i32 = arith.constant 0 : i32
    %c0_i32_0 = arith.constant 0 : i32
    %c0_i32_1 = arith.constant 0 : i32
    return %arg0, %c0_i32, %c0_i32_0 : i32, i32, i32
  }
  func.func @transform_2(%arg0: i32) -> (i32, i32) {
    %c0_i32 = arith.constant 0 : i32
    %c0_i32_0 = arith.constant 0 : i32
    %c0_i32_1 = arith.constant 0 : i32
    return %c0_i32, %c0_i32_0 : i32, i32
  }
  func.func @transform_3(%arg0: i32) -> (i32, i32) {
    %c0_i32 = arith.constant 0 : i32
    %c0_i32_0 = arith.constant 0 : i32
    %c0_i32_1 = arith.constant 0 : i32
    return %c0_i32, %c0_i32_0 : i32, i32
  }
  func.func @transform_4(%arg0: i32) -> (i32, i32) {
    %c0_i32 = arith.constant 0 : i32
    %c0_i32_0 = arith.constant 0 : i32
    %c0_i32_1 = arith.constant 0 : i32
    return %c0_i32, %c0_i32_0 : i32, i32
  }
  func.func @transform_5(%arg0: i32) -> (i32, i32) {
    %c0_i32 = arith.constant 0 : i32
    %c0_i32_0 = arith.constant 0 : i32
    %c0_i32_1 = arith.constant 0 : i32
    return %c0_i32, %c0_i32_0 : i32, i32
  }
  func.func @transform_6(%arg0: i32) -> (i32, i32) {
    %c0_i32 = arith.constant 0 : i32
    %c0_i32_0 = arith.constant 0 : i32
    return %arg0, %c0_i32 : i32, i32
  }
}

</mosaic_0001>

<bundles_post_ra>
// kernel: tpu_custom_call.1
= control target key start
LH: loop header
LB: loop body
LE: loop exit
PB: predicated region body
PF: predicated region fallthrough
CT: control target
= control target key end

     0   :  { %v1023_v1 = vmov 0.0   ;;  %vm1024_vm0 = vmmov 0   ;;  %vm46_vm1 = vcmask 130048   ;;  %v1025_v3 = vmov 65   ;;  %s1199_s0 = inlined_call_operand.vmem [shape: bf16[16,16], index: 0, kind: input, shape index: {}]   ;;  %s1200_s1 = inlined_call_operand.vmem [shape: s8[2,8,8], index: 1, kind: input, shape index: {}]   ;;  %s1201_s2 = inlined_call_operand.vmem [shape: bf16[16,68], index: 2, kind: input, shape index: {}]   ;;  %s1202_s3 = inlined_call_operand.vmem [shape: f32[1,64], index: 3, kind: input, shape index: {}]   ;;  %s1203_s4 = inlined_call_operand.vmem [shape: bf16[64,34], index: 4, kind: input, shape index: {}]   ;;  %s1204_s5 = inlined_call_operand.vmem [shape: f32[1,32], index: 5, kind: input, shape index: {}]   ;;  %s1205_s6 = inlined_call_operand.hbm [shape: f32[16,32], index: 6, kind: output, shape index: {}]  }
   0x1   :  { %v957_v0 = vld [vmem:[%s1201_s2] sm:$0xff]   ;;  %886 = vmatprep.subr.bf16.mxu0 %v1023_v1  ;;  %892 = vmatprep.subr.bf16.mxu1 %v1023_v1 }
   0x2   :  { %v958_v2 = vld [vmem:[%s1199_s0] sm:$0xff]   ;;  %887 = vmatpush3.bf16.msra.mxu0 %v957_v0  ;;  %888 = vmatprep.mubr.msk.bf16.mxu0 %vm1024_vm0, %v1023_v1 }
   0x3   :  { %952 = vset.pattern.permute.xlu1 %v1025_v3  ;;  %898 = vmatprep.subr.bf16.mxu0 %v1023_v1 }
   0x4   :  { %894 = vmatprep.mubr.msk.bf16.mxu1 %vm1024_vm0, %v1023_v1 }
   0x5   :  { %889 = vmatmul.mubr.msk.bf16.vlgmr.msra.gmra.mrb[0].mxu0 %vm46_vm1, %v958_v2 }
   0x6   :  { %11 = vsyncpa [#allocation4], 0  ;;  %900 = vmatprep.mubr.msk.bf16.mxu0 %vm1024_vm0, %v1023_v1  ;;  %v1026_v4 = vmov 64   ;;  %vm158_vm2 = vcmask 1043456   ;;  %s1027_s0 = smov 62   ;;  %v132_v13 = vlaneseq  ;;  %vm141_vm5 = vcmask 64512  }
   0x7   :  { %953 = vset.pattern.permute.xlu0 %v1026_v4  ;;  %v864_v15 = vld [vmem:[%s1200_s1] sm:$0xf]   ;;  %s1028_s1 = smov 96   ;;  %s1029_s30 = smov 32   ;;  %vm202_vm10 = vcmask 261120   ;;  %vm282_vm11 = vcmask 523520  }
   0x8   :  { %v133_v14 = vshrl.u32 %v132_v13, 7  ;;  %v865_v18 = vunpack.c.0.s8 %v864_v15  ;;  %v866_v26 = vunpack.c.1.s8 %v864_v15  ;;  %vm527_vm14 = vcmask 523264  }
   0xa   :  { %v1098_v19 = vsub.s32 0, %v133_v14  ;;  %v210_v20 = vsub.s32 1, %v133_v14  ;;  %v1100_v23 = vcvt.s32.f32 %v865_v18  ;;  %v1104_v32 = vcvt.s32.f32 %v866_v26 }
   0xc   :  { %vm91_vm3 = vcmp.gt.f32.partialorder %v1100_v23, 0.0  ;;  %vm284_vm7 = vcmp.gt.f32.partialorder %v1104_v32, 0.0 }
  0xd8   :  { %v84_v5 = vpop.f32.mrb[0].mxu0 }
  0xd9   :  { %205 = vperm.xlu1 %952, %v84_v5   ;;  %93 = vrot.lane.b32.xlu0 %v84_v5, %s1027_s0  ;;  %v890_v6 = vpop.f32.mrb[1].mxu0  ;;  %v1085_v7 = vpack.c.bf16 %v84_v5, %v84_v5 }
  0xda   :  { %v1087_v8 = vpop.f32.mrb[2].mxu0 }
  0xdb   :  { %v891_v9 = vpop.f32.mrb[3].mxu0  ;;  %v160_v10 = vsel %vm158_vm2, %v1085_v7, 0  ;;  %v346_v62 = vpack.c.bf16 %v1087_v8, %v1087_v8 }
  0xdc   :  { %893 = vmatpush3.bf16.msra.mxu1 %v160_v10 }
  0xdd   :  { %395 = vperm.xlu1 %952, %v1087_v8   ;;  %286 = vrot.lane.b32.xlu0 %v1087_v8, %s1027_s0 }
  0xde   :  { %904 = vmatprep.subr.bf16.mxu1 %v1023_v1 }
  0xe1   :  { %129 = vperm.xlu0 %953, %v84_v5  }
 0x14b   :  { %v94_v11 = vpop.permute.xlu0 %93 }
 0x14c   :  { %96 = vxpose.xlu0.b32.start.end [1/1] (short) (narrow) %v94_v11, 8 }
 0x14f   :  { %v287_v12 = vpop.permute.xlu0 %286 }
 0x150   :  { %289 = vxpose.xlu1.b32.start.end [1/1] (short) (narrow) %v287_v12, 8 }
 0x158   :  { %v206_v16 = vpop.permute.xlu1 %205 }
 0x15c   :  { %v396_v21 = vpop.permute.xlu1 %395 }
 0x160   :  { %v130_v17 = vpop.permute.xlu0 %129 }
 0x16e   :  { %954 = vset.pattern.permute.xlu1 %v1026_v4 }
 0x16f   :  { %322 = vperm.xlu1 %954, %v1087_v8  }
 0x1cc   :  { %v112_v22 = vpop.trf.xlu0 }
 0x1cd   :  { %v135_v24 = vrot.slane %v112_v22, %v1098_v19  ;;  %v211_v25 = vrot.slane %v112_v22, %v210_v20 }
 0x1cf   :  { %v136_v27 = vadd.f32 %v135_v24, %v130_v17  ;;  %v212_v28 = vadd.f32 %v211_v25, %v206_v16 }
 0x1d0   :  { %v305_v29 = vpop.trf.xlu1 }
 0x1d1   :  { %v401_v30 = vrot.slane %v305_v29, %v210_v20  ;;  %vm213_vm4 = vcmp.ge.f32.partialorder %v212_v28, 0.0  ;;  %v214_v31 = vmul.f32 -0.2, %v212_v28  ;;  %vm137_vm6 = vcmp.ge.f32.partialorder %v136_v27, 0.0 }
 0x1d2   :  { %v138_v33 = vmul.f32 -0.2, %v136_v27  ;;  %v328_v45 = vrot.slane %v305_v29, %v1098_v19 }
 0x1d3   :  { %v402_v34 = vadd.f32 %v401_v30, %v396_v21  ;;  %v215_v35 = vsel %vm213_vm4, %v212_v28, %v214_v31  ;;  %v351_v30 = vsel %vm158_vm2, %v346_v62, 0 }
 0x1d4   :  { %v216_v36 = vsel %vm91_vm3, %v215_v35, -9e+15  ;;  %v139_v37 = vsel %vm137_vm6, %v136_v27, %v138_v33  ;;  %v960_v35 = vld [vmem:[%s1203_s4 + $0x8] sm:$0xff]  }
 0x1d5   :  { %v217_v38 = vsel %vm141_vm5, %v216_v36, -inf  ;;  %vm403_vm8 = vcmp.ge.f32.partialorder %v402_v34, 0.0  ;;  %v404_v39 = vmul.f32 -0.2, %v402_v34  ;;  %v140_v40 = vsel %vm91_vm3, %v139_v37, -9e+15 }
 0x1d6   :  { %218 = vmax.xlane.f32.xlu0 %v217_v38  ;;  %v142_v44 = vsel %vm141_vm5, %v140_v40, -inf }
 0x1d7   :  { %v405_v41 = vsel %vm403_vm8, %v402_v34, %v404_v39  ;;  %v959_v34 = vld [vmem:[%s1203_s4] sm:$0xff]   ;;  %v961_v39 = vld [vmem:[%s1203_s4 + $0x10] sm:$0xff]  }
 0x1d8   :  { %v406_v42 = vsel %vm284_vm7, %v405_v41, -9e+15  ;;  %v962_v41 = vld [vmem:[%s1203_s4 + $0x18] sm:$0xff]  }
 0x1d9   :  { %v407_v43 = vsel %vm141_vm5, %v406_v42, -inf }
 0x1da   :  { %408 = vmax.xlane.f32.xlu1 %v407_v43  ;;  %143 = vmax.xlane.f32.xlu0 %v142_v44 }
 0x1ee   :  { %v323_v46 = vpop.permute.xlu1 %322 }
 0x1ef   :  { %v329_v47 = vadd.f32 %v328_v45, %v323_v46  ;;  %v1030_v46 = vmov 32  }
 0x1f0   :  { %955 = vset.pattern.permute.xlu0 %v1030_v46  ;;  %956 = vset.pattern.permute.xlu1 %v1030_v46 }
 0x1f1   :  { %v331_v48 = vmul.f32 -0.2, %v329_v47  ;;  %vm330_vm9 = vcmp.ge.f32.partialorder %v329_v47, 0.0 }
 0x1f3   :  { %v332_v49 = vsel %vm330_vm9, %v329_v47, %v331_v48 }
 0x1f4   :  { %v333_v50 = vsel %vm284_vm7, %v332_v49, -9e+15 }
 0x1f5   :  { %v334_v51 = vsel %vm141_vm5, %v333_v50, -inf }
 0x1f6   :  { %335 = vmax.xlane.f32.xlu0 %v334_v51 }
 0x263   :  { %v219_v52 = vpop.xlane.xlu0 %218 }
 0x264   :  { %v220_v53 = vsub.f32 %v216_v36, %v219_v52 }
 0x266   :  { %v221_v54 = vmul.f32 1.442695, %v220_v53 }
 0x267   :  { %v409_v55 = vpop.xlane.xlu1 %408  ;;  %v144_v63 = vpop.xlane.xlu0 %143 }
 0x268   :  { %963 = vpow2.f32 %v221_v54  ;;  %v410_v56 = vsub.f32 %v406_v42, %v409_v55  ;;  %v145_v0 = vsub.f32 %v140_v40, %v144_v63 }
 0x26a   :  { %v411_v57 = vmul.f32 1.442695, %v410_v56  ;;  %v146_v3 = vmul.f32 1.442695, %v145_v0  ;;  %v847_v56 = vld [vmem:[%s1202_s3] ss:$0 sm:$0xff] }
 0x26b   :  { %s1031_s3 = smov 95  }
 0x26c   :  { %965 = vpow2.f32 %v411_v57 }
 0x26d   :  { %967 = vpow2.f32 %v146_v3 }
 0x272   :  { %v964_v58 = vpop.eup %963 }
 0x273   :  { %v223_v59 = vsel %vm141_vm5, %v964_v58, 0.0 }
 0x274   :  { %224 = vadd.xlane.f32.xlu1 %v223_v59 }
 0x276   :  { %v966_v60 = vpop.eup %965 }
 0x277   :  { %v413_v61 = vsel %vm141_vm5, %v966_v60, 0.0  ;;  %v968_v6 = vpop.eup %967 }
 0x278   :  { %414 = vadd.xlane.f32.xlu0 %v413_v61  ;;  %v148_v9 = vsel %vm141_vm5, %v968_v6, 0.0 }
 0x283   :  { %v336_v2 = vpop.xlane.xlu0 %335 }
 0x284   :  { %v337_v4 = vsub.f32 %v333_v50, %v336_v2 }
 0x285   :  { %230 = vrot.lane.b32.xlu1 %v1085_v7, %s1028_s1 }
 0x286   :  { %v338_v5 = vmul.f32 1.442695, %v337_v4 }
 0x288   :  { %969 = vpow2.f32 %v338_v5 }
 0x28e   :  { %420 = vrot.lane.b32.xlu0 %v346_v62, %s1028_s1 }
 0x292   :  { %v970_v10 = vpop.eup %969 }
 0x293   :  { %v340_v11 = vsel %vm141_vm5, %v970_v10, 0.0 }
 0x2a9   :  { %149 = vadd.xlane.f32.xlu1 %v148_v9 }
 0x2ad   :  { %341 = vadd.xlane.f32.xlu0 %v340_v11 }
 0x301   :  { %v225_v7 = vpop.xlane.xlu1 %224 }
 0x302   :  { %971 = vrcp.f32 %v225_v7 }
 0x305   :  { %v231_v8 = vpop.permute.xlu1 %230  ;;  %v415_v12 = vpop.xlane.xlu0 %414 }
 0x306   :  { %v236_v13 = vsel %vm158_vm2, %v231_v8, 0  ;;  %973 = vrcp.f32 %v415_v12 }
 0x307   :  { %899 = vmatpush3.bf16.msra.mxu0 %v236_v13 }
 0x308   :  { %910 = vmatprep.subr.bf16.mxu0 %v1023_v1 }
 0x309   :  { %v421_v16 = vpop.permute.xlu0 %420 }
 0x30a   :  { %v426_v20 = vsel %vm158_vm2, %v421_v16, 0 }
 0x30c   :  { %v972_v14 = vpop.eup %971 }
 0x30d   :  { %v227_v15 = vmul.f32 %v972_v14, %v964_v58 }
 0x30f   :  { %v228_v17 = vpack.c.bf16 %v227_v15, %v227_v15 }
 0x310   :  { %v974_v18 = vpop.eup %973 }
 0x311   :  { %901 = vmatmul.mubr.msk.bf16.vlgmr.msra.gmra.mrb[4].mxu0 %vm141_vm5, %v228_v17  ;;  %v417_v21 = vmul.f32 %v974_v18, %v966_v60 }
 0x312   :  { %911 = vmatpush3.bf16.msra.mxu0 %v426_v20  ;;  %912 = vmatprep.mubr.msk.bf16.mxu0 %vm1024_vm0, %v1023_v1 }
 0x313   :  { %928 = vmatprep.subr.bf16.mxu0 %v1023_v1  ;;  %v418_v22 = vpack.c.bf16 %v417_v21, %v417_v21 }
 0x319   :  { %913 = vmatmul.mubr.msk.bf16.vlgmr.msra.gmra.mrb[8].mxu0 %vm141_vm5, %v418_v22 }
 0x31a   :  { %930 = vmatprep.mubr.msk.bf16.mxu0 %vm1024_vm0, %v1023_v1 }
 0x336   :  { %v150_v24 = vpop.xlane.xlu1 %149 }
 0x337   :  { %975 = vrcp.f32 %v150_v24 }
 0x33a   :  { %v342_v25 = vpop.xlane.xlu0 %341 }
 0x33b   :  { %977 = vrcp.f32 %v342_v25 }
 0x341   :  { %v976_v26 = vpop.eup %975 }
 0x342   :  { %v152_v27 = vmul.f32 %v976_v26, %v968_v6 }
 0x344   :  { %v153_v28 = vpack.c.bf16 %v152_v27, %v152_v27 }
 0x345   :  { %v978_v29 = vpop.eup %977 }
 0x346   :  { %895 = vmatmul.mubr.msk.bf16.vlgmr.msra.gmra.mrb[0].mxu1 %vm141_vm5, %v153_v28  ;;  %v344_v31 = vmul.f32 %v978_v29, %v970_v10 }
 0x347   :  { %905 = vmatpush3.bf16.msra.mxu1 %v351_v30  ;;  %906 = vmatprep.mubr.msk.bf16.mxu1 %vm1024_vm0, %v1023_v1 }
 0x348   :  { %916 = vmatprep.subr.bf16.mxu1 %v1023_v1  ;;  %v345_v33 = vpack.c.bf16 %v344_v31, %v344_v31 }
 0x34e   :  { %907 = vmatmul.mubr.msk.bf16.vlgmr.msra.gmra.mrb[4].mxu1 %vm141_vm5, %v345_v33 }
 0x34f   :  { %924 = vmatprep.mubr.msk.bf16.mxu1 %vm1024_vm0, %v1023_v1  ;;  %917 = vmatpush3.bf16.msra.mxu1 %v959_v34 }
 0x350   :  { %918 = vmatprep.subr.bf16.mxu1 %v1023_v1 }
 0x353   :  { %919 = vmatpush3.bf16.msra.mxu1 %v960_v35 }
 0x354   :  { %920 = vmatprep.subr.bf16.mxu1 %v1023_v1 }
 0x357   :  { %921 = vmatpush3.bf16.msra.mxu1 %v961_v39 }
 0x358   :  { %922 = vmatprep.subr.bf16.mxu1 %v1023_v1 }
 0x35b   :  { %923 = vmatpush3.bf16.msra.mxu1 %v962_v41 }
 0x3e4   :  { %v272_v36 = vpop.f32.mrb[4].mxu0 }
 0x3e5   :  { %v902_v37 = vpop.f32.mrb[5].mxu0  ;;  %279 = vrot.lane.b32.xlu1 %v272_v36, %s1029_s30 }
 0x3e6   :  { %v275_v38 = vpop.f32.mrb[6].mxu0 }
 0x3e7   :  { %v903_v40 = vpop.f32.mrb[7].mxu0 }
 0x3ec   :  { %v462_v42 = vpop.f32.mrb[8].mxu0 }
 0x3ed   :  { %469 = vrot.lane.b32.xlu0 %v462_v42, %s1029_s30  ;;  %v914_v43 = vpop.f32.mrb[9].mxu0 }
 0x3ee   :  { %v465_v44 = vpop.f32.mrb[10].mxu0 }
 0x3ef   :  { %v915_v45 = vpop.f32.mrb[11].mxu0 }
 0x419   :  { %v196_v47 = vpop.f32.mrb[0].mxu1 }
 0x41a   :  { %203 = vst.msk [vmem:[#allocation2] sm:$0xff] %vm202_vm10, %v196_v47  ;;  %v896_v48 = vpop.f32.mrb[1].mxu1 }
 0x41b   :  { %v199_v49 = vpop.f32.mrb[2].mxu1 }
 0x41c   :  { %v897_v50 = vpop.f32.mrb[3].mxu1 }
 0x421   :  { %v387_v51 = vpop.f32.mrb[4].mxu1 }
 0x422   :  { %393 = vst.msk [vmem:[#allocation2 + $0x8] sm:$0xff] %vm202_vm10, %v387_v51  ;;  %v908_v52 = vpop.f32.mrb[5].mxu1 }
 0x423   :  { %v390_v53 = vpop.f32.mrb[6].mxu1  ;;  %v855_v52 = vld [vmem:[%s1204_s5] ss:$0 sm:$0xff]  ;;  %s1032_s5 = smov [#allocation3]  }
 0x424   :  { %v909_v54 = vpop.f32.mrb[7].mxu1  ;;  %s829_s14 = sshll.u32 %s1032_s5, 4  ;;  %s830_s14 = int_to_ptr.vmem [resolvable:$true] %s829_s14 }
 0x425   :  { %s999_s15 = scalar_lea.vmem %s830_s14, 256  ;;  %p1004_p1 = scmp.lt.s32.totalorder %s830_s14, %s830_s14 }
 0x426   :  { %p1000_p0 = scmp.ne.s32.totalorder %s830_s14, %s999_s15  ;;  %p1005_p2 = scmp.lt.s32.totalorder %s999_s15, %s999_s15 }
 0x428   :  { %p1006_p3 = por %p1005_p2, %p1004_p1 }
 0x42a   :  { %p1007_p4 = pnand %p1006_p3, %p1000_p0 }
 0x457   :  { %v280_v55 = vpop.permute.xlu1 %279 }
 0x458   :  { %283 = vst.msk [vmem:[#allocation2] sm:$0xff] %vm282_vm11, %v280_v55 }
 0x45f   :  { %v470_v57 = vpop.permute.xlu0 %469  ;;  %v473_v58 = vld [vmem:[#allocation2] sm:$0xff] }
 0x460   :  { %472 = vst.msk [vmem:[#allocation2 + $0x8] sm:$0xff] %vm282_vm11, %v470_v57  ;;  %v482_v59 = vadd.f32 %v847_v56, %v473_v58 }
 0x462   :  { %v486_v60 = vmul.f32 1.442695, %v482_v59  ;;  %vm484_vm12 = vcmp.gt.f32.partialorder %v482_v59, 0.0 }
 0x464   :  { %979 = vpow2.f32 %v486_v60 }
 0x467   :  { %v474_v61 = vld [vmem:[#allocation2 + $0x8] sm:$0xff] }
 0x468   :  { %v483_v62 = vadd.f32 %v847_v56, %v474_v61 }
 0x46a   :  { %v488_v63 = vmul.f32 1.442695, %v483_v62  ;;  %vm485_vm13 = vcmp.gt.f32.partialorder %v483_v62, 0.0 }
 0x46c   :  { %981 = vpow2.f32 %v488_v63 }
 0x46e   :  { %v980_v0 = vpop.eup %979 }
 0x46f   :  { %v848_v2 = vadd.f32 -1.0, %v980_v0 }
 0x471   :  { %v492_v5 = vsel %vm484_vm12, %v482_v59, %v848_v2 }
 0x476   :  { %v982_v3 = vpop.eup %981 }
 0x477   :  { %v849_v4 = vadd.f32 -1.0, %v982_v3 }
 0x479   :  { %v493_v6 = vsel %vm485_vm13, %v483_v62, %v849_v4 }
 0x47a   :  { %v494_v9 = vpack.c.bf16 %v493_v6, %v492_v5 }
 0x47c   :  { %925 = vmatmul.mubr.msk.bf16.vlgmr.msra.gmra.mrb[8].mxu1 %vm527_vm14, %v494_v9 }
 0x54f   :  { %v565_v10 = vpop.f32.mrb[8].mxu1 }
 0x550   :  { %v633_v11 = vpack.c.bf16 %v565_v10, %v565_v10  ;;  %609 = vperm.xlu0 %955, %v565_v10   ;;  %573 = vrot.lane.b32.xlu1 %v565_v10, %s1031_s3  ;;  %v926_v7 = vpop.f32.mrb[9].mxu1 }
 0x551   :  { %v568_v8 = vpop.f32.mrb[10].mxu1 }
 0x552   :  { %v927_v12 = vpop.f32.mrb[11].mxu1  ;;  %v645_v13 = vsel %vm158_vm2, %v633_v11, 0  ;;  %v759_v45 = vpack.c.bf16 %v568_v8, %v568_v8 }
 0x553   :  { %929 = vmatpush3.bf16.msra.mxu0 %v645_v13 }
 0x554   :  { %699 = vrot.lane.b32.xlu1 %v568_v8, %s1031_s3  ;;  %934 = vmatprep.subr.bf16.mxu0 %v1023_v1  ;;  %v771_v49 = vsel %vm158_vm2, %v759_v45, 0 }
 0x558   :  { %735 = vperm.xlu1 %956, %v568_v8  }
 0x5c2   :  { %v574_v14 = vpop.permute.xlu1 %573 }
 0x5c3   :  { %576 = vxpose.xlu1.b32.start.end [1/1] (short) (narrow) %v574_v14, 8 }
 0x5c6   :  { %v700_v15 = vpop.permute.xlu1 %699 }
 0x5c7   :  { %702 = vxpose.xlu0.b32.start.end [1/1] (short) (narrow) %v700_v15, 8 }
 0x5cf   :  { %v610_v17 = vpop.permute.xlu0 %609 }
 0x5d7   :  { %v736_v16 = vpop.permute.xlu1 %735 }
 0x643   :  { %v592_v18 = vpop.trf.xlu1 }
 0x644   :  { %v615_v20 = vrot.slane %v592_v18, %v1098_v19 }
 0x646   :  { %v616_v21 = vadd.f32 %v615_v20, %v610_v17 }
 0x647   :  { %v718_v22 = vpop.trf.xlu0 }
 0x648   :  { %v741_v24 = vrot.slane %v718_v22, %v1098_v19  ;;  %vm617_vm15 = vcmp.ge.f32.partialorder %v616_v21, 0.0  ;;  %v618_v25 = vmul.f32 -0.2, %v616_v21 }
 0x64a   :  { %v742_v26 = vadd.f32 %v741_v24, %v736_v16  ;;  %v619_v27 = vsel %vm617_vm15, %v616_v21, %v618_v25 }
 0x64b   :  { %v620_v28 = vsel %vm91_vm3, %v619_v27, -9e+15 }
 0x64c   :  { %v621_v29 = vsel %vm141_vm5, %v620_v28, -inf  ;;  %vm743_vm1 = vcmp.ge.f32.partialorder %v742_v26, 0.0  ;;  %v744_v30 = vmul.f32 -0.2, %v742_v26 }
 0x64d   :  { %622 = vmax.xlane.f32.xlu0 %v621_v29 }
 0x64e   :  { %v745_v31 = vsel %vm743_vm1, %v742_v26, %v744_v30 }
 0x64f   :  { %v746_v33 = vsel %vm284_vm7, %v745_v31, -9e+15 }
 0x650   :  { %v747_v34 = vsel %vm141_vm5, %v746_v33, -inf }
 0x651   :  { %748 = vmax.xlane.f32.xlu1 %v747_v34 }
 0x6da   :  { %v623_v19 = vpop.xlane.xlu0 %622 }
 0x6db   :  { %v624_v35 = vsub.f32 %v620_v28, %v623_v19 }
 0x6dd   :  { %v625_v36 = vmul.f32 1.442695, %v624_v35 }
 0x6de   :  { %v749_v37 = vpop.xlane.xlu1 %748 }
 0x6df   :  { %983 = vpow2.f32 %v625_v36  ;;  %v750_v38 = vsub.f32 %v746_v33, %v749_v37 }
 0x6e1   :  { %v751_v23 = vmul.f32 1.442695, %v750_v38 }
 0x6e3   :  { %985 = vpow2.f32 %v751_v23 }
 0x6e9   :  { %v984_v39 = vpop.eup %983 }
 0x6ea   :  { %v627_v40 = vsel %vm141_vm5, %v984_v39, 0.0 }
 0x6eb   :  { %628 = vadd.xlane.f32.xlu0 %v627_v40 }
 0x6ed   :  { %v986_v41 = vpop.eup %985 }
 0x6ee   :  { %v753_v42 = vsel %vm141_vm5, %v986_v41, 0.0 }
 0x6ef   :  { %754 = vadd.xlane.f32.xlu1 %v753_v42 }
 0x778   :  { %v629_v32 = vpop.xlane.xlu0 %628 }
 0x779   :  { %987 = vrcp.f32 %v629_v32 }
 0x77c   :  { %v755_v43 = vpop.xlane.xlu1 %754 }
 0x77d   :  { %989 = vrcp.f32 %v755_v43 }
 0x783   :  { %v988_v44 = vpop.eup %987 }
 0x784   :  { %v631_v46 = vmul.f32 %v988_v44, %v984_v39 }
 0x786   :  { %v632_v47 = vpack.c.bf16 %v631_v46, %v631_v46 }
 0x787   :  { %v990_v48 = vpop.eup %989 }
 0x788   :  { %931 = vmatmul.mubr.msk.bf16.vlgmr.msra.gmra.mrb[12].mxu0 %vm141_vm5, %v632_v47  ;;  %v757_v50 = vmul.f32 %v990_v48, %v986_v41 }
 0x789   :  { %935 = vmatpush3.bf16.msra.mxu0 %v771_v49  ;;  %936 = vmatprep.mubr.msk.bf16.mxu0 %vm1024_vm0, %v1023_v1 }
 0x78a   :  { %v758_v51 = vpack.c.bf16 %v757_v50, %v757_v50 }
 0x790   :  { %937 = vmatmul.mubr.msk.bf16.vlgmr.msra.gmra.mrb[16].mxu0 %vm141_vm5, %v758_v51 }
 0x85b   :  { %v681_v53 = vpop.f32.mrb[12].mxu0 }
 0x85c   :  { %v682_v54 = vadd.f32 %v855_v52, %v681_v53  ;;  %v932_v55 = vpop.f32.mrb[13].mxu0 }
 0x85d   :  { %v684_v56 = vpop.f32.mrb[14].mxu0 }
 0x85e   :  { %v688_v57 = vmul.f32 1.442695, %v682_v54  ;;  %v933_v58 = vpop.f32.mrb[15].mxu0  ;;  %vm687_vm0 = vcmp.gt.f32.partialorder %v682_v54, 0.0 }
 0x860   :  { %991 = vpow2.f32 %v688_v57 }
 0x863   :  { %v807_v59 = vpop.f32.mrb[16].mxu0 }
 0x864   :  { %v808_v60 = vadd.f32 %v855_v52, %v807_v59  ;;  %v938_v61 = vpop.f32.mrb[17].mxu0 }
 0x865   :  { %v810_v62 = vpop.f32.mrb[18].mxu0 }
 0x866   :  { %v814_v1 = vmul.f32 1.442695, %v808_v60  ;;  %v939_v63 = vpop.f32.mrb[19].mxu0  ;;  %vm813_vm2 = vcmp.gt.f32.partialorder %v808_v60, 0.0 }
 0x868   :  { %993 = vpow2.f32 %v814_v1 }
 0x86a   :  { %v992_v0 = vpop.eup %991 }
 0x86b   :  { %v857_v2 = vadd.f32 -1.0, %v992_v0 }
 0x86d   :  { %v691_v3 = vsel %vm687_vm0, %v682_v54, %v857_v2 }
 0x86e   :  { %v693_v4 = vmul.f32 1.442695, %v691_v3  ;;  %vm692_vm3 = vcmp.gt.f32.partialorder %v691_v3, 0.0 }
 0x870   :  { %995 = vpow2.f32 %v693_v4 }
 0x872   :  { %v994_v5 = vpop.eup %993 }
 0x873   :  { %v861_v6 = vadd.f32 -1.0, %v994_v5 }
 0x875   :  { %v817_v9 = vsel %vm813_vm2, %v808_v60, %v861_v6 }
 0x876   :  { %v819_v10 = vmul.f32 1.442695, %v817_v9  ;;  %vm818_vm4 = vcmp.gt.f32.partialorder %v817_v9, 0.0 }
 0x878   :  { %997 = vpow2.f32 %v819_v10 }
 0x87a   :  { %v996_v11 = vpop.eup %995 }
 0x87b   :  { %v858_v7 = vadd.f32 -1.0, %v996_v11 }
 0x87d   :  { %v696_v8 = vsel %vm692_vm3, %v691_v3, %v858_v7 }
 0x87e   :  { %697 = vst.msk [vmem:[#allocation3] sm:$0xff] %vm202_vm10, %v696_v8 }
 0x882   :  { %v998_v12 = vpop.eup %997 }
 0x883   :  { %v862_v13 = vadd.f32 -1.0, %v998_v12 }
 0x885   :  { %v822_v14 = vsel %vm818_vm4, %v817_v9, %v862_v13 }
 0x886   :  { %823 = vst.msk [vmem:[#allocation3 + $0x8] sm:$0xff] %vm202_vm10, %v822_v14 }
 0x887   :  { %1010 = shalt.err (!%p1007_p4)
}
 0x888   :  { %s1011_s18 = scalar_lea.hbm %s1205_s6, 256 }
 0x889   :  { %p1012_p5 = scmp.ne.s32.totalorder %s1205_s6, %s1011_s18  ;;  %p1015_p6 = scmp.lt.u32.totalorder %s1011_s18, %s1205_s6 }
 0x88b   :  { %p1017_p7 = pnand %p1015_p6, %p1012_p5 }
 0x88d   :  { %1020 = shalt.err (!%p1017_p7)
}
 0x88e   :  { %s1033_s23 = smov 128   ;;  %s1034_s24 = smov 8  }
 0x88f   :  { %835 = dma.vmem_to_hbm [thread:$0]  %s830_s14, 256, %s1205_s6, [#allocation4], %s1033_s23, %s1033_s23, %s1034_s24  }
 0x890   :  { %1021 = dma.done.wait [#allocation4], 256  }
 0x891   :  { %1022 = vsyncadd [#allocation4], 4294967040 }
 0x892   :  { %839 = vsyncpa [#allocation4], 1 }

</bundles_post_ra>
